<compile_context>
chip_gen: v5e
topology: v5e:2x2
jax: 0.10.0
libtpu: 0.0.40
codegen_flags: <defaults>
</compile_context>

<pallas_src>
import numpy as np
import jax
import jax.numpy as jnp
from jax.experimental import pallas as pl
from jax.experimental.pallas import tpu as pltpu


# --------------------- synthetic 'db38'-shaped filter bank --------------------
FILT_LEN = 76  # db38 -> 2 * 38 taps


def make_filters():
    n = np.arange(FILT_LEN)
    h = np.hamming(FILT_LEN).astype(np.float64)
    h = h / h.sum() * np.sqrt(2.0)           # lowpass normalization (sum = sqrt(2))
    rec_lo = h
    dec_lo = rec_lo[::-1].copy()
    rec_hi = ((-1.0) ** n) * dec_lo          # QMF highpass
    dec_hi = rec_hi[::-1].copy()
    return dec_lo, dec_hi, rec_lo, rec_hi


# --------------------- numpy DWT/IDWT (pywt 'symmetric' conventions) ----------
def _sym_ext_indices(N, pad):
    idx = np.arange(-pad, N + pad)
    period = 2 * N
    m = np.mod(idx, period)
    return np.where(m < N, m, period - 1 - m)


def _dwt_step(x, dec_lo, dec_hi):
    """Single-level DWT along axis 0 of a 2-D array, symmetric padding."""
    N = x.shape[0]
    F = len(dec_lo)
    out_len = (N + F - 1) // 2
    ext = x[_sym_ext_indices(N, F - 1)]               # (N + 2F - 2, M)
    valid = N + F - 1
    cA = np.zeros((valid,) + x.shape[1:], dtype=x.dtype)
    cD = np.zeros_like(cA)
    for j in range(F):
        seg = ext[j:j + valid]
        cA += dec_lo[F - 1 - j] * seg
        cD += dec_hi[F - 1 - j] * seg
    return cA[1::2][:out_len], cD[1::2][:out_len]


def _idwt_step(cA, cD, rec_lo, rec_hi):
    """Single-level inverse DWT along axis 0, output length 2n - F + 2."""
    n = cA.shape[0]
    F = len(rec_lo)
    out_len = 2 * n - F + 2
    up_a = np.zeros((2 * n,) + cA.shape[1:], dtype=cA.dtype)
    up_d = np.zeros_like(up_a)
    up_a[0::2] = cA
    up_d[0::2] = cD
    full = np.zeros((2 * n + F - 1,) + cA.shape[1:], dtype=cA.dtype)
    for j in range(F):
        full[j:j + 2 * n] += rec_lo[j] * up_a + rec_hi[j] * up_d
    start = F - 2
    return full[start:start + out_len]


def _wavedec(x, dec_lo, dec_hi, level):
    coeffs = []
    a = x
    for _ in range(level):
        a, d = _dwt_step(a, dec_lo, dec_hi)
        coeffs.insert(0, d)
    coeffs.insert(0, a)
    return coeffs        # [cA_L, cD_L, ..., cD_1]


def _waverec(coeffs, rec_lo, rec_hi):
    a = coeffs[0]
    for d in coeffs[1:]:
        if a.shape[0] == d.shape[0] + 1:   # pywt length fixup
            a = a[:-1]
        a = _idwt_step(a, d, rec_lo, rec_hi)
    return a


def build_band_matrices(seq_len, level):
    """(level+1, L, L) matrices: W[b] @ x == waverec(mask_band_b(wavedec(x)))."""
    dec_lo, dec_hi, rec_lo, rec_hi = make_filters()
    eye = np.eye(seq_len, dtype=np.float64)
    coeffs = _wavedec(eye, dec_lo, dec_hi, level)
    mats = []
    for b in range(level + 1):
        masked = [c if i == b else np.zeros_like(c) for i, c in enumerate(coeffs)]
        w = _waverec(masked, rec_lo, rec_hi)
        assert w.shape[0] == seq_len, "waverec length mismatch for this seq_len"
        mats.append(w)
    return np.stack(mats, axis=0).astype(np.float32)


# ------------------------------ Pallas kernels ---------------------------------
def _dwt_matmul_kernel(w_ref, x_ref, o_ref):
    # Single reduction step (K fits one tile): no accumulator scratch, no
    # zero-fill, no final copy -- straight MXU result to the output tile.
    o_ref[...] = jnp.dot(w_ref[...], x_ref[...],
                         preferred_element_type=jnp.float32).astype(o_ref.dtype)


def _dwt_matmul_acc_kernel(w_ref, x_ref, o_ref):
    # Multi-step reduction: the f32 output block's index_map ignores k, so it
    # stays VMEM-resident across the (last, "arbitrary") k axis -- accumulate
    # directly into it instead of a separate scratch buffer.
    @pl.when(pl.program_id(2) == 0)
    def _():
        o_ref[...] = jnp.zeros_like(o_ref)

    o_ref[...] += jnp.dot(w_ref[...], x_ref[...],
                          preferred_element_type=jnp.float32)


def _round_up(v, m):
    return ((v + m - 1) // m) * m


def dwt_forward(x, band_mats, *, compute_dtype=jnp.bfloat16):
    """x: (L, B, C); band_mats: (bands, L, L) -> (L, B, C, bands) float32.

    compute_dtype: operand dtype fed to the MXU (accumulation is always f32).
    bf16 (default) halves HBM/VMEM traffic; use f32 for bit-tight checks.
    """
    L, B, C = x.shape
    n_bands = band_mats.shape[0]
    M = B * C
    R = n_bands * L          # fused output rows (band axis folded into rows)
    K = L                    # contraction dim = seq_len

    # ---- lane (N) axis: pad minor dim to 128 only when needed (unmasked vst) --
    TN_CAP = 512
    Mp = _round_up(M, 128)
    tn = min(Mp, TN_CAP)
    Mp = _round_up(Mp, tn)
    grid_n = Mp // tn

    # ---- contraction (K) axis: full K when it fits one tile, else 512-wide ---
    TK_CAP = 512             # multiple of 256 -> fills the v6e/v7x 256-wide MXU
    if K <= TK_CAP:
        tk, Kp = K, K
    else:
        tk = TK_CAP
        Kp = _round_up(K, tk)
    grid_k = Kp // tk

    # ---- row (M) axis: 16-aligned (bf16 sublane packing; also valid for f32) -
    ALIGN_M = 16
    TM_CAP = 512
    tm = min(_round_up(R, ALIGN_M), TM_CAP)
    if grid_n == 1 and _round_up(R, tm) // tm == 1 and R > ALIGN_M:
        # v7x megacore: guarantee >= 2 blocks along a "parallel" grid axis so
        # both TensorCores get work at small/moderate shapes.
        tm = _round_up((R + 1) // 2, ALIGN_M)
    Rp = _round_up(R, tm)
    grid_m = Rp // tm

    # ---- operands (pad with zeros; zero rows/cols contribute nothing) --------
    w = band_mats.reshape(R, K)
    x2d = x.reshape(L, M)
    if (Rp, Kp) != (R, K):
        w = jnp.pad(w, ((0, Rp - R), (0, Kp - K)))
    if (Kp, Mp) != (K, M):
        x2d = jnp.pad(x2d, ((0, Kp - K), (0, Mp - M)))
    w = w.astype(compute_dtype)
    x2d = x2d.astype(compute_dtype)

    out_shape = jax.ShapeDtypeStruct((Rp, Mp), jnp.float32)

    if grid_k == 1:
        # Common case (L <= 512): one reduction step, 2-D grid, no scratch.
        out2d = pl.pallas_call(
            _dwt_matmul_kernel,
            out_shape=out_shape,
            grid_spec=pltpu.PrefetchScalarGridSpec(
                num_scalar_prefetch=0,
                grid=(grid_m, grid_n),
                in_specs=[
                    pl.BlockSpec((tm, Kp), lambda i, j: (i, 0)),   # W tile
                    pl.BlockSpec((Kp, tn), lambda i, j: (0, j)),   # x tile
                ],
                out_specs=pl.BlockSpec((tm, tn), lambda i, j: (i, j)),
            ),
            compiler_params=pltpu.CompilerParams(
                dimension_semantics=("parallel", "parallel")),
        )(w, x2d)
    else:
        # Large-L fallback: reduction axis last, accumulate into f32 output.
        out2d = pl.pallas_call(
            _dwt_matmul_acc_kernel,
            out_shape=out_shape,
            grid_spec=pltpu.PrefetchScalarGridSpec(
                num_scalar_prefetch=0,
                grid=(grid_m, grid_n, grid_k),
                in_specs=[
                    pl.BlockSpec((tm, tk), lambda i, j, k: (i, k)),
                    pl.BlockSpec((tk, tn), lambda i, j, k: (k, j)),
                ],
                out_specs=pl.BlockSpec((tm, tn), lambda i, j, k: (i, j)),
            ),
            compiler_params=pltpu.CompilerParams(
                dimension_semantics=("parallel", "parallel", "arbitrary")),
        )(w, x2d)

    # Strip padding, split the fused row axis back into (bands, L) and match the
    # torch module, which stacks band reconstructions along a new axis=3.
    # NOTE: consumers that accept band-major (bands, L, B, C) output can skip
    # the lane-hostile final transpose entirely.
    out = out2d[:R, :M].reshape(n_bands, L, B, C)
    return jnp.transpose(out, (1, 2, 3, 0))          # (L, B, C, bands)


# ----------------------------------- main --------------------------------------
if __name__ == "__main__":
    class Configs:
        d_level = 4      # -> 5 bands (ya4, yd4, yd3, yd2, yd1)
        seq_len = 16
        gpu = 0          # unused on TPU

    L, B, C = Configs.seq_len, 2, 8

    band_mats_np = build_band_matrices(L, Configs.d_level)
    band_mats = jnp.asarray(band_mats_np)

    key = jax.random.PRNGKey(0)
    x = jax.random.normal(key, (L, B, C), dtype=jnp.float32)
    x_np = np.asarray(x).reshape(L, B * C)

    # ---- f32 operands: tight check of the fused linear operator --------------
    sp32 = jax.block_until_ready(dwt_forward(x, band_mats,
                                             compute_dtype=jnp.float32))
    ref32 = np.einsum("bts,sm->btm", band_mats_np, x_np)
    ref32 = ref32.reshape(Configs.d_level + 1, L, B, C).transpose(1, 2, 3, 0)
    assert sp32.shape == (L, B, C, Configs.d_level + 1)
    np.testing.assert_allclose(np.asarray(sp32), ref32, rtol=1e-5, atol=1e-5)

    # ---- bf16 operands (production default): compare against a reference that
    # applies the same bf16 quantization to W and x, so the check stays tight.
    sp16 = jax.block_until_ready(dwt_forward(x, band_mats))
    w_q = np.asarray(band_mats.astype(jnp.bfloat16).astype(jnp.float32))
    x_q = np.asarray(jnp.asarray(x_np).astype(jnp.bfloat16).astype(jnp.float32))
    ref16 = np.einsum("bts,sm->btm", w_q, x_q)
    ref16 = ref16.reshape(Configs.d_level + 1, L, B, C).transpose(1, 2, 3, 0)
    assert sp16.shape == (L, B, C, Configs.d_level + 1)
    np.testing.assert_allclose(np.asarray(sp16), ref16, rtol=1e-4, atol=1e-4)

    print("KERNEL_OK")
</pallas_src>

<mosaic_0001>
module attributes {stable_mosaic.version = 11 : i64} {
  func.func @_dwt_matmul_kernel(%arg0: i32, %arg1: i32, %arg2: memref<48x16xf32, #tpu.memory_space<vmem>>, %arg3: memref<16x128xf32, #tpu.memory_space<vmem>>, %arg4: memref<48x128xf32, #tpu.memory_space<vmem>>) attributes {dimension_semantics = [#tpu.dimension_semantics<parallel>, #tpu.dimension_semantics<parallel>], iteration_bounds = array<i64: 2, 1>, scalar_prefetch = 0 : i64, scratch_operands = 0 : i64, tpu.core_type = #tpu.core_type<tc>, window_params = [{transform_indices = @transform_0, window_bounds = array<i64: 48, 16>}, {transform_indices = @transform_1, window_bounds = array<i64: 16, 128>}, {transform_indices = @transform_2, window_bounds = array<i64: 48, 128>}]} {
    %c0 = arith.constant 0 : index
    %c0_0 = arith.constant 0 : index
    %0 = vector.load %arg2[%c0, %c0_0] : memref<48x16xf32, #tpu.memory_space<vmem>>, vector<48x16xf32>
    %c0_1 = arith.constant 0 : index
    %c0_2 = arith.constant 0 : index
    %1 = vector.load %arg3[%c0_1, %c0_2] : memref<16x128xf32, #tpu.memory_space<vmem>>, vector<16x128xf32>
    %cst = arith.constant dense<0.000000e+00> : vector<48x128xf32>
    %2 = tpu.matmul %0, %1, %cst {dimension_numbers = #tpu.dot_dimension_numbers<[1], [0], [0], [1], [0, 0, 1, 1], [], []>} : vector<48x16xf32>, vector<16x128xf32>, vector<48x128xf32> -> vector<48x128xf32>
    %c0_3 = arith.constant 0 : index
    %c0_4 = arith.constant 0 : index
    %3 = vector.load %arg4[%c0_3, %c0_4] : memref<48x128xf32, #tpu.memory_space<vmem>>, vector<48x128xf32>
    tpu.vector_store %arg4[%c0_3, %c0_4], %2 {strides = array<i32>} : memref<48x128xf32, #tpu.memory_space<vmem>>, vector<48x128xf32>,
    return
  }
  func.func @transform_0(%arg0: i32, %arg1: i32) -> (i32, i32) {
    %c0_i32 = arith.constant 0 : i32
    %c0_i32_0 = arith.constant 0 : i32
    return %arg0, %c0_i32 : i32, i32
  }
  func.func @transform_1(%arg0: i32, %arg1: i32) -> (i32, i32) {
    %c0_i32 = arith.constant 0 : i32
    %c0_i32_0 = arith.constant 0 : i32
    return %c0_i32, %arg1 : i32, i32
  }
  func.func @transform_2(%arg0: i32, %arg1: i32) -> (i32, i32) {
    %c0_i32 = arith.constant 0 : i32
    return %arg0, %arg1 : i32, i32
  }
}

</mosaic_0001>

<bundles_post_ra>
// kernel: tpu_custom_call.1
= control target key start
LH: loop header
LB: loop body
LE: loop exit
PB: predicated region body
PF: predicated region fallthrough
CT: control target
= control target key end

     0   :  { %7 = vsyncpa [#allocation3], 0  ;;  %s628_s0 = inlined_call_operand.vmem [shape: f32[96,16], index: 0, kind: input, shape index: {}]   ;;  %s629_s1 = inlined_call_operand.vmem [shape: f32[16,128], index: 1, kind: input, shape index: {}]   ;;  %s630_s2 = inlined_call_operand.hbm [shape: f32[96,128], index: 2, kind: output, shape index: {}]  }
   0x1   :  { %9 = vsyncpa [#allocation3 + $0x1], 0  ;;  %s526_s9 = smov 0   ;;  %s528_s10 = smov 0  }
   0x2   :  { %s530_s11 = smov 0   ;;  %s532_s12 = smov 0  }
   0x3   :  { %s534_s13 = smov 0   ;;  %s536_s14 = smov 0  }
   0x4 LB: > { %s348_s15 = sadd.s32 4294967295, %s507_s14   ;;  %s349_s16 = sadd.s32 4294967294, %s507_s14   ;;  %s507_s14 = sphi %s536_s14, %s15_s14   ;;  %s503_s13 = sphi %s534_s13, %s637_s13   ;;  %s499_s12 = sphi %s532_s12, %s636_s12   ;;  %s495_s11 = sphi %s530_s11, %s635_s11   ;;  %s491_s10 = sphi %s528_s10, %s634_s10   ;;  %s487_s9 = sphi %s526_s9, %s633_s9  }
   0x5   : > { %s27_s17 = sadd.s32 1, %s503_s13  ;;  %s88_s18 = sadd.s32 1, %s495_s11 }
   0x6   : > { %p29_p0 = scmp.ge.s32.totalorder %s27_s17, 2  ;;  %p98_p1 = scmp.ne.s32.totalorder %s495_s11, %s491_s10 }
   0x7   : > { %p99_p2 = scmp.eq.s32.totalorder %s348_s15, 1  ;;  %p104_p3 = scmp.ne.s32.totalorder %s491_s10, %s487_s9 }
   0x8   : > { %s639_s17 = smov (%p29_p0, %s27_s17), 0  ;;  %p105_p5 = scmp.eq.s32.totalorder %s349_s16, 1 }
   0x9   : > { %p566_p4 = por %p99_p2, %p98_p1  ;;  %s83_s20 = ssub.s32 %s503_s13, %s639_s17 }
   0xa   : > { %p353_p6 = scmp.ge.s32.totalorder %s507_s14, 1  ;;  %p86_p7 = scmp.eq.s32.totalorder %s83_s20, 0 }
   0xb   : > { %p573_p8 = por %p105_p5, %p104_p3  ;;  %p139_p9 = scmp.lt.s32.totalorder %s507_s14, 3 }
   0xc   : > { %s579_s22 = scalar_select %p86_p7, %s495_s11, %s88_s18  }
   0xd   : > { %p140_p10 = pnand %p353_p6, %p139_p9 }
   0xe   : > { %s165_s27 = smul.u32 (!%p140_p10), 6, %s499_s12  ;;  %s162_s4 = sand.u32 (!%p140_p10), 1, %s491_s10  }
   0xf   : > { %143 = sbr.rel (%p140_p10) target bundleno = 169 (0xa9), region = 28  ;;  %s245_s23 = scalar_lea.sflag (!%p140_p10), [#allocation3], %s162_s4 }
  0x10   : > { %p166_p11 = scmp.lt.s32.totalorder (!%p140_p10), %s165_s27, 11  ;;  %s371_s5 = smul.u32 (!%p140_p10), 48, %s162_s4 }
  0x11   : > { %s364_s7 = smul.u32 (!%p140_p10), 48, %s499_s12 }
  0x12   : > { %s164_s6 = scalar_lea.vmem (!%p140_p10), [#allocation2], %s371_s5 }
  0x13   : > { %s257_s16 = scalar_lea.hbm (!%p140_p10), %s630_s2, %s364_s7  ;;  %s258_s18 = sshll.u32 (!%p140_p10), %s164_s6, 4  ;;  %s259_s18 = int_to_ptr.vmem [resolvable:$true] %s258_s18 }
  0x14   : > { %v183_v0 = vld [vmem:[%s629_s1 + $0x8] sm:$0xff]  ;;  %v182_v1 = vld [vmem:[%s629_s1] sm:$0xff]  ;;  %s641_s27 = smov (!%p166_p11, %s165_s27), 11  ;;  %vm184_vm0 = vcmask 130048   ;;  %s260_s20 = sshll.u32 %s257_s16, 4  ;;  %s261_s20 = int_to_ptr.hbm [resolvable:$true] %s260_s20 }
  0x15   : > { %366 = vmatpush.msra.mxu2 %v183_v0  ;;  %365 = vmatpush.msra.mxu1 %v183_v0  ;;  %s354_s28 = sshll.u32 %s641_s27, 3  ;;  %s443_s24 = sshra.s32 %s261_s20, 4  ;;  %s444_s24 = int_to_ptr.hbm [resolvable:$true] %s443_s24 }
  0x16   : > { %367 = vmatpush.msra.mxu3 %v183_v0  ;;  %217 = vmatpush.msra.mxu0 %v183_v0  ;;  %s169_s3 = scalar_lea.vmem %s628_s0, %s354_s28  ;;  %s445_s12 = scalar_lea.hbm %s444_s24, 48 }
  0x17   : > { %369 = vmatpush.msra.mxu2 %v182_v1  ;;  %368 = vmatpush.msra.mxu1 %v182_v1  ;;  %v179_v2 = vld [vmem:[%s169_s3 + $0x18] sm:$0xff]  ;;  %v177_v3 = vld [vmem:[%s169_s3 + $0x8] sm:$0xff]  ;;  %v176_v5 = vld [vmem:[%s169_s3] sm:$0xff]  ;;  %p446_p12 = scmp.ne.s32.totalorder %s444_s24, %s445_s12  ;;  %s449_s27 = scalar_lea.hbm %s630_s2, 96 }
  0x18   : > { %370 = vmatpush.msra.mxu3 %v182_v1  ;;  %218 = vmatpush.msra.mxu0 %v182_v1  ;;  %v181_v4 = vld [vmem:[%s169_s3 + $0x28] sm:$0xff]  ;;  %v180_v6 = vld [vmem:[%s169_s3 + $0x20] sm:$0xff]  ;;  %v178_v7 = vld [vmem:[%s169_s3 + $0x10] sm:$0xff]  ;;  %p450_p1 = scmp.lt.s32.totalorder %s444_s24, %s630_s2  ;;  %p451_p2 = scmp.lt.s32.totalorder %s449_s27, %s445_s12 }
  0x19   : > { %358 = vmatmul.msk.f32.vlgmr.msra.gmra.mxu2 %vm184_vm0, %v179_v2  ;;  %356 = vmatmul.msk.f32.vlgmr.msra.gmra.mxu1 %vm184_vm0, %v177_v3  ;;  %p447_p13 = pnand %p446_p12, %p566_p4 }
  0x1a   : > { %360 = vmatmul.msk.f32.vlgmr.msra.gmra.mxu3 %vm184_vm0, %v181_v4  ;;  %355 = vmatmul.msk.f32.vlgmr.msra.gmra.mxu0 %vm184_vm0, %v176_v5  ;;  %p452_p3 = por %p451_p2, %p450_p1 }
  0x1b   : > { %p448_p0 = pneg %p447_p13 }
  0x1d   : > { %p453_p5 = pnand %p452_p3, %p448_p0 }
  0x21   : > { %359 = vmatmul.msk.f32.gmra.mxu2 %vm184_vm0, %v180_v6  ;;  %357 = vmatmul.msk.f32.gmra.mxu1 %vm184_vm0, %v178_v7 }
  0x96   : > { %v223_v8 = vpop.f32.mrf.mxu1 }
  0x97   : > { %239 = vst [vmem:[%s164_s6 + $0x8] sm:$0xff] %v223_v8  ;;  %v220_v9 = vpop.f32.mrf.mxu0 }
  0x98   : > { %238 = vst [vmem:[%s164_s6] sm:$0xff] %v220_v9 }
  0x9c   : > { %v229_v10 = vpop.f32.mrf.mxu2 }
  0x9d   : > { %241 = vst [vmem:[%s164_s6 + $0x18] sm:$0xff] %v229_v10  ;;  %v235_v11 = vpop.f32.mrf.mxu3 }
  0x9e   : > { %v226_v12 = vpop.f32.mrf.mxu1  ;;  %243 = vst [vmem:[%s164_s6 + $0x28] sm:$0xff] %v235_v11 }
  0x9f   : > { %240 = vst [vmem:[%s164_s6 + $0x10] sm:$0xff] %v226_v12 }
  0xa4   : > { %v232_v13 = vpop.f32.mrf.mxu2 }
  0xa5   : > { %242 = vst [vmem:[%s164_s6 + $0x20] sm:$0xff] %v232_v13 }
  0xa6   : > { %456 = shalt.err (!%p453_p5)
}
  0xa7   : > { %s509_s30 = smov 128   ;;  %s510_s3 = smov 8  }
  0xa8   : > { %372 = dma.vmem_to_hbm [thread:$0]  (%p566_p4), %s259_s18, 768, %s261_s20, %s245_s23, %s509_s30, %s509_s30, %s510_s3  }
  0xa9 PF: > { %p378_p6 = scmp.ge.s32.totalorder %s507_s14, 2  ;;  %s275_s4 = sand.u32 1, %s487_s9  }
  0xaa   : > { %s276_s5 = scalar_lea.sflag [#allocation3], %s275_s4 }
  0xab   : > { %p375_p7 = pnand %p378_p6, %p573_p8 }
  0xad   : > { %p376_p9 = pneg %p375_p7 }
  0xaf   : > { %482 = dma.done.wait (%p376_p9), %s276_s5, 768  }
  0xb0   : > { %484 = vsyncadd (%p376_p9), %s276_s5, 4294966528  ;;  %s15_s14 = sadd.s32 1, %s507_s14   ;;  %s633_s9 = smov %s491_s10 }
  0xb1   : > { %p12_p10 = scmp.ge.s32.totalorder %s15_s14, 4   ;;  %s634_s10 = smov %s495_s11 }
  0xb2   : > { %s635_s11 = smov %s579_s22  ;;  %s636_s12 = smov %s503_s13 }
  0xb3   : > { %s637_s13 = smov %s639_s17  ;;  %14 = sbr.rel (!%p12_p10) target bundleno = 4 (0x4), region = 66 }
  0xb8   :  { %282 = vsyncpa [#allocation3], 1 }
  0xb9   :  { %284 = vsyncpa [#allocation3 + $0x1], 1 }

</bundles_post_ra>
